<compile_context>
chip_gen: v7x
topology: tpu7x:2x2x1
jax: 0.10.0
libtpu: 0.0.40
codegen_flags: <defaults>
</compile_context>

<pallas_src>
import functools

import numpy as np
import jax
import jax.numpy as jnp
from jax import lax
from jax.experimental import pallas as pl
from jax.experimental.pallas import tpu as pltpu

NEG_SLOPE = 0.2       # GATConv default LeakyReLU negative_slope
NEG_INF = -1e30       # finite sentinel keeps exp(m_old - m_new) well defined
DEFAULT_TILE = 256    # dst/src node tile size (review: 256 on v6e/v7x)


def _leaky_relu(x):
    # max(x, 0.2x) == where(x > 0, x, 0.2x) for 0 < slope < 1 (2 VPU ops, not 3)
    return jnp.maximum(x, NEG_SLOPE * x)


def _elu(x):
    return jnp.where(x > 0, x, jnp.exp(x) - 1.0)


# --------------------------------------------------------------------------
# Kernel A: fused projection, gridded over node-row tiles.
#   h = x @ W + b     (W = [w1 | w_res] for layer 1, minimally padded w2 for 2)
#   e = h @ A         (A = folded block-diag attention vectors -> all heads in
#                      one matmul instead of 2*heads rank-1 dot_generals)
# --------------------------------------------------------------------------
def _proj_kernel(x_ref, w_ref, b_ref, a_ref, h_ref, e_ref):
    h = jnp.dot(x_ref[...], w_ref[...],
                preferred_element_type=jnp.float32) + b_ref[...]
    h_ref[...] = h
    e_ref[...] = jnp.dot(h, a_ref[...], preferred_element_type=jnp.float32)


def proj_call(x, w, b, a, *, tm):
    n, fin = x.shape
    m = w.shape[1]
    p = a.shape[1]
    cost = pl.CostEstimate(
        flops=2 * n * fin * m + 2 * n * m * p,
        transcendentals=0,
        bytes_accessed=4 * (n * fin + fin * m + m + m * p + n * m + n * p))
    return pl.pallas_call(
        _proj_kernel,
        out_shape=(jax.ShapeDtypeStruct((n, m), jnp.float32),
                   jax.ShapeDtypeStruct((n, p), jnp.float32)),
        grid_spec=pltpu.PrefetchScalarGridSpec(
            num_scalar_prefetch=0,
            grid=(n // tm,),
            in_specs=[pl.BlockSpec((tm, fin), lambda i: (i, 0)),
                      pl.BlockSpec((fin, m), lambda i: (0, 0)),
                      pl.BlockSpec((1, m), lambda i: (0, 0)),
                      pl.BlockSpec((m, p), lambda i: (0, 0))],
            out_specs=(pl.BlockSpec((tm, m), lambda i: (i, 0)),
                       pl.BlockSpec((tm, p), lambda i: (i, 0)))),
        compiler_params=pltpu.CompilerParams(
            dimension_semantics=("parallel",)),
        cost_estimate=cost,
    )(x, w, b, a)


# --------------------------------------------------------------------------
# Kernel B: layer-1 GAT attention + aggregation, fused with residual + ELU.
# Grid = (dst tiles [parallel], scheduled src tiles [arbitrary]); online
# masked softmax; emits per-node (m, l) softmax stats (no dense alpha).
# Sparse tile skipping via 2 scalar-prefetch arrays (tiles, counts).
# --------------------------------------------------------------------------
def _gat1_attn_kernel(tiles_ref, cnt_ref, e_dst_ref, e_srcT_ref, h_src_ref,
                      adj_ref, res_ref, b_ref, out_ref, stats_ref,
                      m_sc, l_sc, acc_sc, *, heads, dim):
    i = pl.program_id(0)
    j = pl.program_id(1)

    @pl.when(j == 0)
    def _():
        m_sc[...] = jnp.full_like(m_sc, NEG_INF)
        l_sc[...] = jnp.zeros_like(l_sc)
        acc_sc[...] = jnp.zeros_like(acc_sc)

    # sparse sweep: only the first cnt_ref[i] scheduled src tiles do work;
    # the remaining grid steps see a clamped (repeated) tile and are skipped.
    @pl.when(j < cnt_ref[i])
    def _():
        mask = adj_ref[...] > 0                      # int8 compare, hoisted
        e_dst = e_dst_ref[...]                       # [tm, H]
        e_srcT = e_srcT_ref[...]                     # [H, tk]
        for hd in range(heads):                      # static unroll (H = 8)
            logits = _leaky_relu(e_dst[:, hd:hd + 1] + e_srcT[hd:hd + 1, :])
            masked = jnp.where(mask, logits, NEG_INF)
            m_old = m_sc[:, hd:hd + 1]
            m_new = jnp.maximum(m_old, jnp.max(masked, axis=1, keepdims=True))
            a = jnp.exp(m_old - m_new)
            p = jnp.where(mask, jnp.exp(logits - m_new), 0.0)
            l_sc[:, hd:hd + 1] = (a * l_sc[:, hd:hd + 1]
                                  + jnp.sum(p, axis=1, keepdims=True))
            sl = slice(hd * dim, (hd + 1) * dim)
            # per-head V slice loaded inside the loop (bounded live range)
            acc_sc[:, sl] = a * acc_sc[:, sl] + jnp.dot(
                p, h_src_ref[:, sl], preferred_element_type=jnp.float32)
            m_sc[:, hd:hd + 1] = m_new

    @pl.when(j == pl.num_programs(1) - 1)
    def _():
        hd_tot = heads * dim
        # expand 1/l from [tm, H] to [tm, H*D] with one tiny one-hot matmul
        # instead of `heads` narrow masked scratch stores (exact reciprocal
        # keeps the reference tolerance).
        inv_l = 1.0 / l_sc[...]
        row = lax.broadcasted_iota(jnp.int32, (heads, hd_tot), 0)
        col = lax.broadcasted_iota(jnp.int32, (heads, hd_tot), 1) // dim
        expand = (row == col).astype(jnp.float32)          # [H, H*D] one-hot
        scale = jnp.dot(inv_l, expand, preferred_element_type=jnp.float32)
        out_ref[...] = _elu(acc_sc[...] * scale + b_ref[...] + res_ref[...])
        # coalesced (m | l) stats output
        stats_ref[:, :heads] = m_sc[...]
        stats_ref[:, heads:] = l_sc[...]


def gat1_attn_call(tiles, counts, e_dst, e_srcT, h_src, adj, res, b1, *,
                   heads, dim, tm, tk, total_tiles):
    n_pad = h_src.shape[0]
    hd_tot = heads * dim
    n_dst = n_pad // tm
    max_count = tiles.shape[1]
    cost = pl.CostEstimate(
        flops=total_tiles * (2 * tm * tk * hd_tot + 12 * heads * tm * tk),
        transcendentals=total_tiles * heads * tm * tk,
        bytes_accessed=total_tiles * (tm * tk + 4 * tk * hd_tot)
        + n_dst * 4 * tm * (3 * hd_tot + 4 * heads))
    grid_spec = pltpu.PrefetchScalarGridSpec(
        num_scalar_prefetch=2,
        grid=(n_dst, max_count),
        in_specs=[
            pl.BlockSpec((tm, heads), lambda i, j, t, c: (i, 0)),         # e_dst
            pl.BlockSpec((heads, tk), lambda i, j, t, c: (0, t[i, j])),   # e_srcT
            pl.BlockSpec((tk, hd_tot), lambda i, j, t, c: (t[i, j], 0)),  # h_src
            pl.BlockSpec((tm, tk), lambda i, j, t, c: (i, t[i, j])),      # adj
            pl.BlockSpec((tm, hd_tot), lambda i, j, t, c: (i, 0)),        # res
            pl.BlockSpec((1, hd_tot), lambda i, j, t, c: (0, 0)),         # b1
        ],
        out_specs=(pl.BlockSpec((tm, hd_tot), lambda i, j, t, c: (i, 0)),
                   pl.BlockSpec((tm, 2 * heads), lambda i, j, t, c: (i, 0))),
        scratch_shapes=[pltpu.VMEM((tm, heads), jnp.float32),
                        pltpu.VMEM((tm, heads), jnp.float32),
                        pltpu.VMEM((tm, hd_tot), jnp.float32)])
    return pl.pallas_call(
        functools.partial(_gat1_attn_kernel, heads=heads, dim=dim),
        out_shape=(jax.ShapeDtypeStruct((n_pad, hd_tot), jnp.float32),
                   jax.ShapeDtypeStruct((n_pad, 2 * heads), jnp.float32)),
        grid_spec=grid_spec,
        compiler_params=pltpu.CompilerParams(
            dimension_semantics=("parallel", "arbitrary")),
        cost_estimate=cost,
    )(tiles, counts, e_dst, e_srcT, h_src, adj, res, b1)


# --------------------------------------------------------------------------
# Kernel C: layer-2 GAT attention (1 head, classes padded only to 8 lanes),
# fused with ELU and masked log_softmax.  Same sparse online-softmax sweep.
# --------------------------------------------------------------------------
def _gat2_attn_kernel(tiles_ref, cnt_ref, e_dst_ref, e_srcT_ref, h_ref,
                      adj_ref, b_ref, out_ref, stats_ref,
                      m_sc, l_sc, acc_sc, *, num_classes):
    i = pl.program_id(0)
    j = pl.program_id(1)

    @pl.when(j == 0)
    def _():
        m_sc[...] = jnp.full_like(m_sc, NEG_INF)
        l_sc[...] = jnp.zeros_like(l_sc)
        acc_sc[...] = jnp.zeros_like(acc_sc)

    @pl.when(j < cnt_ref[i])
    def _():
        mask = adj_ref[...] > 0
        logits = _leaky_relu(e_dst_ref[...] + e_srcT_ref[...])   # [tm, tk]
        masked = jnp.where(mask, logits, NEG_INF)
        m_old = m_sc[...]
        m_new = jnp.maximum(m_old, jnp.max(masked, axis=1, keepdims=True))
        a = jnp.exp(m_old - m_new)
        p = jnp.where(mask, jnp.exp(logits - m_new), 0.0)
        l_sc[...] = a * l_sc[...] + jnp.sum(p, axis=1, keepdims=True)
        acc_sc[...] = a * acc_sc[...] + jnp.dot(
            p, h_ref[...], preferred_element_type=jnp.float32)
        m_sc[...] = m_new

    @pl.when(j == pl.num_programs(1) - 1)
    def _():
        out = acc_sc[...] * (1.0 / l_sc[...]) + b_ref[...]
        out = _elu(out)
        # log_softmax over the first `num_classes` lanes of the 8-wide slab
        cols = lax.broadcasted_iota(jnp.int32, out.shape, 1)
        valid = cols < num_classes
        z = jnp.where(valid, out, NEG_INF)
        z = z - jnp.max(z, axis=1, keepdims=True)
        lse = jnp.log(jnp.sum(jnp.where(valid, jnp.exp(z), 0.0),
                              axis=1, keepdims=True))
        out_ref[...] = z - lse
        stats_ref[:, 0:1] = m_sc[...]
        stats_ref[:, 1:2] = l_sc[...]


def gat2_attn_call(tiles, counts, e_dst, e_srcT, h2, adj, b2, *,
                   num_classes, tm, tk, total_tiles):
    n_pad, cls_pad = h2.shape
    n_dst = n_pad // tm
    max_count = tiles.shape[1]
    cost = pl.CostEstimate(
        flops=total_tiles * (2 * tm * tk * cls_pad + 12 * tm * tk),
        transcendentals=total_tiles * tm * tk + n_dst * tm * cls_pad,
        bytes_accessed=total_tiles * (tm * tk + 4 * tk * cls_pad)
        + n_dst * 4 * tm * (2 * cls_pad + 4))
    grid_spec = pltpu.PrefetchScalarGridSpec(
        num_scalar_prefetch=2,
        grid=(n_dst, max_count),
        in_specs=[
            pl.BlockSpec((tm, 1), lambda i, j, t, c: (i, 0)),             # e_dst
            pl.BlockSpec((1, tk), lambda i, j, t, c: (0, t[i, j])),       # e_srcT
            pl.BlockSpec((tk, cls_pad), lambda i, j, t, c: (t[i, j], 0)), # h2 (V)
            pl.BlockSpec((tm, tk), lambda i, j, t, c: (i, t[i, j])),      # adj
            pl.BlockSpec((1, cls_pad), lambda i, j, t, c: (0, 0)),        # b2
        ],
        out_specs=(pl.BlockSpec((tm, cls_pad), lambda i, j, t, c: (i, 0)),
                   pl.BlockSpec((tm, 2), lambda i, j, t, c: (i, 0))),
        scratch_shapes=[pltpu.VMEM((tm, 1), jnp.float32),
                        pltpu.VMEM((tm, 1), jnp.float32),
                        pltpu.VMEM((tm, cls_pad), jnp.float32)])
    return pl.pallas_call(
        functools.partial(_gat2_attn_kernel, num_classes=num_classes),
        out_shape=(jax.ShapeDtypeStruct((n_pad, cls_pad), jnp.float32),
                   jax.ShapeDtypeStruct((n_pad, 2), jnp.float32)),
        grid_spec=grid_spec,
        compiler_params=pltpu.CompilerParams(
            dimension_semantics=("parallel", "arbitrary")),
        cost_estimate=cost,
    )(tiles, counts, e_dst, e_srcT, h2, adj, b2)


# --------------------------------------------------------------------------
# Host-side sparse tile schedule: per dst tile, the list of non-empty src
# tiles (clamped/repeated past the count so skipped steps re-use the same
# block index and cost no extra DMA) plus the count.
# --------------------------------------------------------------------------
def _build_tile_schedule(dst_nodes, src_nodes, n_pad, tm, tk):
    n_dst, n_src = n_pad // tm, n_pad // tk
    occ = np.zeros((n_dst, n_src), dtype=bool)
    occ[np.asarray(dst_nodes) // tm, np.asarray(src_nodes) // tk] = True
    counts = np.maximum(occ.sum(axis=1).astype(np.int32), 1)
    max_count = int(counts.max())
    tiles = np.zeros((n_dst, max_count), dtype=np.int32)
    for ti in range(n_dst):
        idx = np.nonzero(occ[ti])[0].astype(np.int32)
        if idx.size == 0:
            idx = np.zeros((1,), np.int32)
        tiles[ti, :idx.size] = idx
        tiles[ti, idx.size:] = idx[-1]
    total = int(occ.sum())
    return jnp.asarray(tiles), jnp.asarray(counts), total


# --------------------------------------------------------------------------
# Parameters (same shapes as the PyTorch module's tensors)
# --------------------------------------------------------------------------
def init_params(key, num_features, num_classes, heads=8, hidden_dim=8):
    ks = jax.random.split(key, 10)

    def init(k, shape, scale=0.1):
        return scale * jax.random.normal(k, shape, jnp.float32)

    return dict(
        heads=heads, hidden_dim=hidden_dim,
        w1=init(ks[0], (num_features, heads * hidden_dim)),
        att_src1=init(ks[1], (heads, hidden_dim)),
        att_dst1=init(ks[2], (heads, hidden_dim)),
        b1=init(ks[3], (1, heads * hidden_dim)),
        w2=init(ks[4], (heads * hidden_dim, num_classes)),
        att_src2=init(ks[5], (1, num_classes)),
        att_dst2=init(ks[6], (1, num_classes)),
        b2=init(ks[7], (1, num_classes)),
        w_res=init(ks[8], (num_features, heads * hidden_dim)),
        b_res=init(ks[9], (1, heads * hidden_dim)),
    )


# --------------------------------------------------------------------------
# Forward wrapper
# --------------------------------------------------------------------------
def gnn_with_attention_forward(x, edge_index, params, *, tile=DEFAULT_TILE):
    """x: [N, F] float32; edge_index: [2, E] int (row0=src, row1=dst, no self loops)."""
    n, fin = x.shape
    heads, dim = params["heads"], params["hidden_dim"]
    hd_tot = heads * dim
    c = params["w2"].shape[1]
    cls_pad = max(8, ((c + 7) // 8) * 8)       # minimal pad for the layer-2 V

    # tile pick: biggest requested size, but keep >= 2 dst tiles when possible
    # (v7x megacore balance) and floor at 128 (8,128 tiling).
    tile = max(128, min(512, (int(tile) // 128) * 128))
    while tile > 128 and pl.cdiv(n, tile) < 2:
        tile -= 128
    n_pad = pl.cdiv(n, tile) * tile

    src, dst = edge_index[0], edge_index[1]
    loop = jnp.arange(n, dtype=edge_index.dtype)
    src_sl = jnp.concatenate([src, loop])
    dst_sl = jnp.concatenate([dst, loop])
    edge_index_sl = jnp.stack([src_sl, dst_sl], axis=0)

    # dense 0/1 adjacency built directly in int8 (dst-major).  Padded rows get
    # a self loop so every dst row sees >= 1 valid entry under the sparse tile
    # schedule and their (discarded) outputs stay finite.
    pad_ids = jnp.arange(n, n_pad, dtype=jnp.int32)
    adj = jnp.zeros((n_pad, n_pad), jnp.int8)
    adj = adj.at[dst_sl, src_sl].set(1)
    adj = adj.at[pad_ids, pad_ids].set(1)
    # TODO(synk): per-tile edge lists could replace the dense N^2 adjacency.

    # host-side sparse tile schedule (edge_index is concrete; wrapper not jitted)
    dst_np = np.concatenate([np.asarray(dst_sl), np.arange(n, n_pad)])
    src_np = np.concatenate([np.asarray(src_sl), np.arange(n, n_pad)])
    tiles, counts, total_tiles = _build_tile_schedule(dst_np, src_np, n_pad,
                                                      tile, tile)

    xp = jnp.zeros((n_pad, fin), jnp.float32).at[:n].set(x)

    # ----- layer 1: fused projection ([w1 | w_res], bias [0 | b_res]) + folded
    #       block-diagonal attention vectors (one matmul for all heads).
    w_cat = jnp.concatenate([params["w1"], params["w_res"]], axis=1)   # [F, 2HD]
    b_cat = jnp.concatenate([jnp.zeros((1, hd_tot), jnp.float32),
                             params["b_res"]], axis=1)
    a_fold = jnp.zeros((2 * hd_tot, 2 * heads), jnp.float32)
    for h in range(heads):
        a_fold = a_fold.at[h * dim:(h + 1) * dim, h].set(params["att_src1"][h])
        a_fold = a_fold.at[h * dim:(h + 1) * dim, heads + h].set(params["att_dst1"][h])

    proj1, e1 = proj_call(xp, w_cat, b_cat, a_fold, tm=tile)
    h1_feat, res = proj1[:, :hd_tot], proj1[:, hd_tot:]
    e_src1, e_dst1 = e1[:, :heads], e1[:, heads:]

    h1, stats1 = gat1_attn_call(tiles, counts, e_dst1, jnp.transpose(e_src1),
                                h1_feat, adj, res, params["b1"],
                                heads=heads, dim=dim, tm=tile, tk=tile,
                                total_tiles=total_tiles)
    m1, l1 = stats1[:, :heads], stats1[:, heads:]
    # dropout -> identity (eval mode)

    # ----- layer 2: classes padded only to 8 lanes for the attention V.
    w2p = jnp.zeros((hd_tot, cls_pad), jnp.float32).at[:, :c].set(params["w2"])
    b2p = jnp.zeros((1, cls_pad), jnp.float32).at[:, :c].set(params["b2"])
    a2_fold = jnp.zeros((cls_pad, 2), jnp.float32)
    a2_fold = a2_fold.at[:c, 0].set(params["att_src2"][0])
    a2_fold = a2_fold.at[:c, 1].set(params["att_dst2"][0])

    h2, e2 = proj_call(h1, w2p, jnp.zeros((1, cls_pad), jnp.float32), a2_fold,
                       tm=tile)
    e_src2, e_dst2 = e2[:, 0:1], e2[:, 1:2]

    logp_pad, stats2 = gat2_attn_call(tiles, counts, e_dst2,
                                      jnp.transpose(e_src2), h2, adj, b2p,
                                      num_classes=c, tm=tile, tk=tile,
                                      total_tiles=total_tiles)
    m2, l2 = stats2[:, 0:1], stats2[:, 1:2]
    logp = logp_pad[:n, :c]
    # dropout -> identity (eval mode)

    # exact per-edge attention weights recomputed from the softmax statistics
    # (replaces any dense [heads, N, N] attention writeback).
    def edge_alpha(e_dst_n, e_src_n, m_n, l_n):
        logit = _leaky_relu(e_dst_n[dst_sl] + e_src_n[src_sl])
        return jnp.exp(logit - m_n[dst_sl]) / l_n[dst_sl]

    attn1 = edge_alpha(e_dst1, e_src1, m1, l1)      # [E+N, heads]
    attn2 = edge_alpha(e_dst2, e_src2, m2, l2)      # [E+N, 1]
    return logp, (edge_index_sl, attn1), (edge_index_sl, attn2)


# --------------------------------------------------------------------------
# Pure-JAX reference (same dense math) for a correctness check.
# --------------------------------------------------------------------------
def _reference_forward(x, adj, dst_sl, src_sl, params):
    n = x.shape[0]
    heads, dim = params["heads"], params["hidden_dim"]

    def dense_gat(xin, w, asrc, adst, b, nh, d, concat):
        h = (xin @ w).reshape(n, nh, d)
        e_src = jnp.einsum("nhd,hd->hn", h, asrc.reshape(nh, d))
        e_dst = jnp.einsum("nhd,hd->hn", h, adst.reshape(nh, d))
        logits = _leaky_relu(e_dst[:, :, None] + e_src[:, None, :])
        masked = jnp.where(adj[None] > 0, logits, NEG_INF)
        m = masked.max(-1, keepdims=True)
        p = jnp.where(adj[None] > 0, jnp.exp(masked - m), 0.0)
        alpha = p / p.sum(-1, keepdims=True)
        out = jnp.einsum("hij,jhd->ihd", alpha, h)
        out = out.reshape(n, nh * d) if concat else out.mean(axis=1)
        return out + b, alpha

    res = x @ params["w_res"] + params["b_res"]
    g1, a1 = dense_gat(x, params["w1"], params["att_src1"], params["att_dst1"],
                       params["b1"], heads, dim, True)
    h1 = _elu(g1 + res)
    g2, a2 = dense_gat(h1, params["w2"], params["att_src2"], params["att_dst2"],
                       params["b2"], 1, params["b2"].shape[1], False)
    logp = jax.nn.log_softmax(_elu(g2), axis=1)
    return logp, a1[:, dst_sl, src_sl].T, a2[:, dst_sl, src_sl].T


if __name__ == "__main__":
    N, NUM_FEATURES, NUM_CLASSES, HEADS, HIDDEN = 200, 16, 4, 8, 8

    key = jax.random.PRNGKey(0)
    kx, kp = jax.random.split(key)
    x = jax.random.normal(kx, (N, NUM_FEATURES), jnp.float32)

    idx = np.arange(N)
    src = np.concatenate([idx, idx])
    dst = np.concatenate([(idx + 1) % N, (idx - 1) % N])
    edge_index = jnp.asarray(np.stack([src, dst]), dtype=jnp.int32)   # [2, 2N]

    params = init_params(kp, NUM_FEATURES, NUM_CLASSES, HEADS, HIDDEN)

    logp, (ei1, attn1), (ei2, attn2) = gnn_with_attention_forward(x, edge_index, params)
    jax.block_until_ready((logp, attn1, attn2))

    # cross-check against the pure-JAX reference
    loop = jnp.arange(N, dtype=jnp.int32)
    src_sl = jnp.concatenate([edge_index[0], loop])
    dst_sl = jnp.concatenate([edge_index[1], loop])
    adj_ref = jnp.zeros((N, N), jnp.float32).at[dst_sl, src_sl].set(1.0)
    ref_logp, ref_a1, ref_a2 = _reference_forward(x, adj_ref, dst_sl, src_sl, params)
    np.testing.assert_allclose(np.asarray(logp), np.asarray(ref_logp), rtol=2e-4, atol=1e-5)
    np.testing.assert_allclose(np.asarray(attn1), np.asarray(ref_a1), rtol=2e-4, atol=1e-5)
    np.testing.assert_allclose(np.asarray(attn2), np.asarray(ref_a2), rtol=2e-4, atol=1e-5)

    print("KERNEL_OK")
</pallas_src>

<mosaic_0001>
module attributes {stable_mosaic.version = 11 : i64} {
  func.func @_proj_kernel(%arg0: i32, %arg1: memref<128x16xf32, #tpu.memory_space<vmem>>, %arg2: memref<16x128xf32, #tpu.memory_space<vmem>>, %arg3: memref<1x128xf32, #tpu.memory_space<vmem>>, %arg4: memref<128x16xf32, #tpu.memory_space<vmem>>, %arg5: memref<128x128xf32, #tpu.memory_space<vmem>>, %arg6: memref<128x16xf32, #tpu.memory_space<vmem>>) attributes {dimension_semantics = [#tpu.dimension_semantics<parallel>], iteration_bounds = array<i64: 2>, scalar_prefetch = 0 : i64, scratch_operands = 0 : i64, tpu.core_type = #tpu.core_type<tc>, window_params = [{transform_indices = @transform_0, window_bounds = array<i64: 128, 16>}, {pipeline_mode = #tpu.pipeline_mode<synchronous>, transform_indices = @transform_1, window_bounds = array<i64: 16, 128>}, {pipeline_mode = #tpu.pipeline_mode<synchronous>, transform_indices = @transform_2, window_bounds = array<i64: 1, 128>}, {pipeline_mode = #tpu.pipeline_mode<synchronous>, transform_indices = @transform_3, window_bounds = array<i64: 128, 16>}, {transform_indices = @transform_4, window_bounds = array<i64: 128, 128>}, {transform_indices = @transform_5, window_bounds = array<i64: 128, 16>}]} {
    %c0 = arith.constant 0 : index
    %c0_0 = arith.constant 0 : index
    %0 = vector.load %arg1[%c0, %c0_0] : memref<128x16xf32, #tpu.memory_space<vmem>>, vector<128x16xf32>
    %c0_1 = arith.constant 0 : index
    %c0_2 = arith.constant 0 : index
    %1 = vector.load %arg2[%c0_1, %c0_2] : memref<16x128xf32, #tpu.memory_space<vmem>>, vector<16x128xf32>
    %cst = arith.constant dense<0.000000e+00> : vector<128x128xf32>
    %2 = tpu.matmul %0, %1, %cst {dimension_numbers = #tpu.dot_dimension_numbers<[1], [0], [0], [1], [0, 0, 1, 1], [], []>} : vector<128x16xf32>, vector<16x128xf32>, vector<128x128xf32> -> vector<128x128xf32>
    %c0_3 = arith.constant 0 : index
    %c0_4 = arith.constant 0 : index
    %3 = vector.load %arg3[%c0_3, %c0_4] : memref<1x128xf32, #tpu.memory_space<vmem>>, vector<1x128xf32>
    %4 = vector.broadcast %3 : vector<1x128xf32> to vector<128x128xf32>
    %5 = arith.addf %2, %4 : vector<128x128xf32>
    %c0_5 = arith.constant 0 : index
    %c0_6 = arith.constant 0 : index
    %6 = vector.load %arg5[%c0_5, %c0_6] : memref<128x128xf32, #tpu.memory_space<vmem>>, vector<128x128xf32>
    tpu.vector_store %arg5[%c0_5, %c0_6], %5 {strides = array<i32>} : memref<128x128xf32, #tpu.memory_space<vmem>>, vector<128x128xf32>,
    %c0_7 = arith.constant 0 : index
    %c0_8 = arith.constant 0 : index
    %7 = vector.load %arg4[%c0_7, %c0_8] : memref<128x16xf32, #tpu.memory_space<vmem>>, vector<128x16xf32>
    %cst_9 = arith.constant dense<0.000000e+00> : vector<128x16xf32>
    %8 = tpu.matmul %5, %7, %cst_9 {dimension_numbers = #tpu.dot_dimension_numbers<[1], [0], [0], [1], [0, 0, 1, 1], [], []>} : vector<128x128xf32>, vector<128x16xf32>, vector<128x16xf32> -> vector<128x16xf32>
    %c0_10 = arith.constant 0 : index
    %c0_11 = arith.constant 0 : index
    %9 = vector.load %arg6[%c0_10, %c0_11] : memref<128x16xf32, #tpu.memory_space<vmem>>, vector<128x16xf32>
    tpu.vector_store %arg6[%c0_10, %c0_11], %8 {strides = array<i32>} : memref<128x16xf32, #tpu.memory_space<vmem>>, vector<128x16xf32>,
    return
  }
  func.func @transform_0(%arg0: i32) -> (i32, i32) {
    %c0_i32 = arith.constant 0 : i32
    %c0_i32_0 = arith.constant 0 : i32
    return %arg0, %c0_i32 : i32, i32
  }
  func.func @transform_1(%arg0: i32) -> (i32, i32) {
    %c0_i32 = arith.constant 0 : i32
    %c0_i32_0 = arith.constant 0 : i32
    %c0_i32_1 = arith.constant 0 : i32
    return %c0_i32, %c0_i32_0 : i32, i32
  }
  func.func @transform_2(%arg0: i32) -> (i32, i32) {
    %c0_i32 = arith.constant 0 : i32
    %c0_i32_0 = arith.constant 0 : i32
    %c0_i32_1 = arith.constant 0 : i32
    return %c0_i32, %c0_i32_0 : i32, i32
  }
  func.func @transform_3(%arg0: i32) -> (i32, i32) {
    %c0_i32 = arith.constant 0 : i32
    %c0_i32_0 = arith.constant 0 : i32
    %c0_i32_1 = arith.constant 0 : i32
    return %c0_i32, %c0_i32_0 : i32, i32
  }
  func.func @transform_4(%arg0: i32) -> (i32, i32) {
    %c0_i32 = arith.constant 0 : i32
    %c0_i32_0 = arith.constant 0 : i32
    return %arg0, %c0_i32 : i32, i32
  }
  func.func @transform_5(%arg0: i32) -> (i32, i32) {
    %c0_i32 = arith.constant 0 : i32
    %c0_i32_0 = arith.constant 0 : i32
    return %arg0, %c0_i32 : i32, i32
  }
}

</mosaic_0001>

<bundles_post_ra>
// kernel: tpu_custom_call.1
= control target key start
LH: loop header
LB: loop body
LE: loop exit
PB: predicated region body
PF: predicated region fallthrough
CT: control target
= control target key end

     0   :  { %11 = vsyncpa [#allocation3], 0  ;;  %s1378_s0 = inlined_call_operand.vmem [shape: f32[256,16], index: 0, kind: input, shape index: {}]   ;;  %s1379_s1 = inlined_call_operand.vmem [shape: f32[16,128], index: 1, kind: input, shape index: {}]   ;;  %s1380_s2 = inlined_call_operand.vmem [shape: f32[1,128], index: 2, kind: input, shape index: {}]   ;;  %s1381_s3 = inlined_call_operand.vmem [shape: f32[128,16], index: 3, kind: input, shape index: {}]   ;;  %s1382_s4 = inlined_call_operand.hbm [shape: f32[256,128], index: 4, kind: output, shape index: {0}]   ;;  %s1383_s5 = inlined_call_operand.vmem [shape: f32[256,16], index: 5, kind: output, shape index: {1}]  }
   0x1   :  { %13 = vsyncpa [#allocation3 + $0x1], 0  ;;  %s1118_s18 = smov 0   ;;  %s1120_s19 = smov 0  }
   0x2   :  { %s1122_s20 = smov 0   ;;  %s1124_s21 = smov 0  }
   0x3 LB: > { %s1139_s22 = sadd.s32 4294967295, %s1083_s21   ;;  %s762_s23 = sadd.s32 4294967294, %s1083_s21   ;;  %s1083_s21 = sphi %s1124_s21, %s1389_s21   ;;  %s1079_s20 = sphi %s1122_s20, %s1388_s20   ;;  %s1075_s19 = sphi %s1120_s19, %s1387_s19   ;;  %s1071_s18 = sphi %s1118_s18, %s1386_s18  }
   0x4   : > { %s1143_s24 = sadd.s32 1, %s1083_s21   ;;  %s115_s25 = sadd.s32 1, %s1079_s20 }
   0x5   : > { %s112_s26 = ssub.s32 %s1083_s21, %s1143_s24  ;;  %p125_p0 = scmp.ne.s32.totalorder %s1079_s20, %s1075_s19 }
   0x6   : > { %p113_p1 = scmp.eq.s32.totalorder %s112_s26, 0  ;;  %p126_p2 = scmp.eq.s32.totalorder %s1139_s22, 1 }
   0x7   : > { %p131_p3 = scmp.ne.s32.totalorder %s1075_s19, %s1071_s18  ;;  %p132_p4 = scmp.eq.s32.totalorder %s762_s23, 1 }
   0x8   : > { %s1154_s27 = scalar_select %p113_p1, %s1079_s20, %s115_s25  }
   0x9   : > { %p1156_p5 = por %p126_p2, %p125_p0  ;;  %p1160_p6 = por %p132_p4, %p131_p3 }
   0xa   : > { %p765_p7 = scmp.ge.s32.totalorder %s1083_s21, 1  ;;  %p194_p8 = scmp.lt.s32.totalorder %s1083_s21, 3 }
   0xc   : > { %p195_p9 = pnand %p765_p7, %p194_p8 }
   0xd   : > { %v256_v0 = vld [vmem:[%s1379_s1] sm:$0xff] (!%p195_p9)  ;;  %v257_v1 = vld [vmem:[%s1379_s1 + $0x8] sm:$0xff] (!%p195_p9)  ;;  %s767_s9 = sshll.u32 (!%p195_p9), %s1139_s22, 4  ;;  %v477_v5 = vld [vmem:[%s1381_s3 + $0x10] sm:$0xff] (!%p195_p9)  ;;  %vm265_vm0 = vcmask (!%p195_p9), 130048   ;;  %s217_s25 = sand.u32 (!%p195_p9), 1, %s1075_s19  }
   0xe   : > { %198 = sbr.rel (%p195_p9) target bundleno = 484 (0x1e4), region = 36  ;;  %v475_v2 = vld [vmem:[%s1381_s3] sm:$0xff] (!%p195_p9)  ;;  %v928_v3 = vpack.c.bf16 (!%p195_p9), %v257_v1, %v256_v0  ;;  %p228_p10 = scmp.lt.s32.totalorder (!%p195_p9), %s767_s9, 31  ;;  %v476_v4 = vld [vmem:[%s1381_s3 + $0x8] sm:$0xff] (!%p195_p9)  ;;  %v478_v6 = vld [vmem:[%s1381_s3 + $0x18] sm:$0xff] (!%p195_p9) }
   0xf   : > { %v932_v7 = vpack.c.bf16 (!%p195_p9), %v476_v4, %v475_v2  ;;  %v936_v8 = vpack.c.bf16 (!%p195_p9), %v478_v6, %v477_v5  ;;  %v479_v9 = vld [vmem:[%s1381_s3 + $0x20] sm:$0xff] (!%p195_p9)  ;;  %v480_v10 = vld [vmem:[%s1381_s3 + $0x28] sm:$0xff] (!%p195_p9)  ;;  %v481_v16 = vld [vmem:[%s1381_s3 + $0x30] sm:$0xff] (!%p195_p9)  ;;  %s766_s26 = sshll.u32 (!%p195_p9), %s217_s25, 7  ;;  %s793_s8 = sshll.u32 (!%p195_p9), %s1139_s22, 11 }
  0x10   : > { %929 = vmatprep.subr.bf16.mxu0 (!%p195_p9), %v928_v3  ;;  %v940_v14 = vpack.c.bf16 (!%p195_p9), %v480_v10, %v479_v9  ;;  %v482_v17 = vld [vmem:[%s1381_s3 + $0x38] sm:$0xff] (!%p195_p9)  ;;  %v483_v21 = vld [vmem:[%s1381_s3 + $0x40] sm:$0xff] (!%p195_p9)  ;;  %v484_v22 = vld [vmem:[%s1381_s3 + $0x48] sm:$0xff] (!%p195_p9)  ;;  %s1269_s7 = scalar_lea.vmem (!%p195_p9), [#allocation2], %s766_s26  ;;  %s1292_s13 = scalar_lea.hbm (!%p195_p9), %s1382_s4, %s793_s8 }
  0x11   : > { %931 = vmatpush3.bf16.msra.mxu0 (!%p195_p9), %v928_v3  ;;  %964 = vmatprep.subr.bf16.mxu1 (!%p195_p9), %v932_v7  ;;  %v944_v19 = vpack.c.bf16 (!%p195_p9), %v482_v17, %v481_v16  ;;  %v948_v24 = vpack.c.bf16 (!%p195_p9), %v484_v22, %v483_v21  ;;  %v485_v26 = vld [vmem:[%s1381_s3 + $0x50] sm:$0xff] (!%p195_p9)  ;;  %v486_v27 = vld [vmem:[%s1381_s3 + $0x58] sm:$0xff] (!%p195_p9)  ;;  %v487_v31 = vld [vmem:[%s1381_s3 + $0x60] sm:$0xff] (!%p195_p9)  ;;  %s671_s10 = sshll.u32 (!%p195_p9), %s1269_s7, 4  ;;  %s1298_s14 = scalar_lea.sflag (!%p195_p9), [#allocation3], %s217_s25  ;;  %s1294_s10 = int_to_ptr.vmem [resolvable:$true] %s671_s10 }
  0x12   : > { %933 = vmatprep.subr.bf16.mxu0 (!%p195_p9), %v932_v7  ;;  %972 = vmatpush3.bf16.msra.mxu1 (!%p195_p9), %v932_v7  ;;  %v952_v29 = vpack.c.bf16 (!%p195_p9), %v486_v27, %v485_v26  ;;  %v488_v32 = vld [vmem:[%s1381_s3 + $0x68] sm:$0xff] (!%p195_p9)  ;;  %v489_v40 = vld [vmem:[%s1381_s3 + $0x70] sm:$0xff] (!%p195_p9)  ;;  %v490_v41 = vld [vmem:[%s1381_s3 + $0x78] sm:$0xff] (!%p195_p9)  ;;  %s1021_s15 = scalar_lea.vmem (!%p195_p9), %s1294_s10, 2048  ;;  %s1085_s22 = smov (!%p195_p9), [#allocation2]  }
  0x13   : > { %965 = vmatprep.subr.bf16.mxu1 (!%p195_p9), %v936_v8  ;;  %v956_v34 = vpack.c.bf16 (!%p195_p9), %v488_v32, %v487_v31  ;;  %v960_v42 = vpack.c.bf16 (!%p195_p9), %v490_v41, %v489_v40  ;;  %v771_v43 = vld [vmem:[%s1380_s2] ss:$0 sm:$0xff] (!%p195_p9)  ;;  %p1022_p11 = scmp.ne.s32.totalorder (!%p195_p9), %s1294_s10, %s1021_s15  ;;  %s1025_s16 = sshll.u32 (!%p195_p9), %s1085_s22, 4  ;;  %s1026_s16 = int_to_ptr.vmem [resolvable:$false] %s1025_s16 }
  0x14   : > { %s1027_s17 = scalar_lea.vmem (!%p195_p9), %s1026_s16, 4096  ;;  %p1028_p0 = scmp.lt.s32.totalorder (!%p195_p9), %s1294_s10, %s1026_s16 }
  0x15   : > { %s1391_s9 = smov (!%p228_p10, %s767_s9), 31  ;;  %p1023_p12 = pnand %p1022_p11, %p1156_p5 }
  0x16   : > { %s768_s23 = sshll.u32 %s1391_s9, 3  ;;  %973 = vmatpush3.bf16.msra.mxu1 %v936_v8  ;;  %p1029_p1 = scmp.lt.s32.totalorder %s1027_s17, %s1021_s15 }
  0x17   : > { %s1193_s30 = scalar_lea.vmem %s1378_s0, %s768_s23  ;;  %966 = vmatprep.subr.bf16.mxu1 %v940_v14  ;;  %p1024_p13 = pneg %p1023_p12 }
  0x18   : > { %v240_v11 = vld [vmem:[%s1193_s30] sm:$0xff]  ;;  %v241_v12 = vld [vmem:[%s1193_s30 + $0x8] sm:$0xff]  ;;  %v242_v13 = vld [vmem:[%s1193_s30 + $0x10] sm:$0xff]  ;;  %p1030_p2 = por %p1029_p1, %p1028_p0 }
  0x19   : > { %848 = vmatprep.mubr.msk.f32.mxu0 %vm265_vm0, %v240_v11  ;;  %v243_v15 = vld [vmem:[%s1193_s30 + $0x18] sm:$0xff]  ;;  %v244_v18 = vld [vmem:[%s1193_s30 + $0x20] sm:$0xff]  ;;  %v245_v20 = vld [vmem:[%s1193_s30 + $0x28] sm:$0xff] }
  0x1a   : > { %849 = vmatmul.mubr.msk.f32.vlgmr.msra.gmra.mrb[0].mxu0 %vm265_vm0, %v241_v12  ;;  %974 = vmatpush3.bf16.msra.mxu1 %v940_v14  ;;  %v246_v23 = vld [vmem:[%s1193_s30 + $0x30] sm:$0xff]  ;;  %v247_v25 = vld [vmem:[%s1193_s30 + $0x38] sm:$0xff]  ;;  %v248_v28 = vld [vmem:[%s1193_s30 + $0x40] sm:$0xff]  ;;  %p1031_p3 = pnand %p1030_p2, %p1024_p13 }
  0x1b   : > { %851 = vmatprep.mubr.msk.f32.mxu0 %vm265_vm0, %v242_v13  ;;  %935 = vmatpush3.bf16.msra.mxu0 %v932_v7  ;;  %v249_v30 = vld [vmem:[%s1193_s30 + $0x48] sm:$0xff]  ;;  %v250_v33 = vld [vmem:[%s1193_s30 + $0x50] sm:$0xff]  ;;  %v251_v35 = vld [vmem:[%s1193_s30 + $0x58] sm:$0xff] }
  0x1c   : > { %937 = vmatprep.subr.bf16.mxu0 %v936_v8  ;;  %967 = vmatprep.subr.bf16.mxu1 %v944_v19  ;;  %v252_v36 = vld [vmem:[%s1193_s30 + $0x60] sm:$0xff]  ;;  %v253_v37 = vld [vmem:[%s1193_s30 + $0x68] sm:$0xff]  ;;  %v254_v38 = vld [vmem:[%s1193_s30 + $0x70] sm:$0xff] }
  0x1d   : > { %v255_v39 = vld [vmem:[%s1193_s30 + $0x78] sm:$0xff] }
  0x1e   : > { %852 = vmatmul.mubr.msk.f32.gmra.mrb[2].mxu0 %vm265_vm0, %v243_v15  ;;  %975 = vmatpush3.bf16.msra.mxu1 %v944_v19 }
  0x1f   : > { %854 = vmatprep.mubr.msk.f32.mxu0 %vm265_vm0, %v244_v18  ;;  %939 = vmatpush3.bf16.msra.mxu0 %v936_v8 }
  0x20   : > { %941 = vmatprep.subr.bf16.mxu0 %v940_v14  ;;  %968 = vmatprep.subr.bf16.mxu1 %v948_v24 }
  0x22   : > { %855 = vmatmul.mubr.msk.f32.gmra.mrb[4].mxu0 %vm265_vm0, %v245_v20  ;;  %976 = vmatpush3.bf16.msra.mxu1 %v948_v24 }
  0x23   : > { %857 = vmatprep.mubr.msk.f32.mxu0 %vm265_vm0, %v246_v23  ;;  %943 = vmatpush3.bf16.msra.mxu0 %v940_v14 }
  0x24   : > { %945 = vmatprep.subr.bf16.mxu0 %v944_v19  ;;  %969 = vmatprep.subr.bf16.mxu1 %v952_v29 }
  0x26   : > { %858 = vmatmul.mubr.msk.f32.gmra.mrb[6].mxu0 %vm265_vm0, %v247_v25  ;;  %977 = vmatpush3.bf16.msra.mxu1 %v952_v29 }
  0x27   : > { %860 = vmatprep.mubr.msk.f32.mxu0 %vm265_vm0, %v248_v28  ;;  %947 = vmatpush3.bf16.msra.mxu0 %v944_v19 }
  0x28   : > { %949 = vmatprep.subr.bf16.mxu0 %v948_v24  ;;  %970 = vmatprep.subr.bf16.mxu1 %v956_v34 }
  0x2a   : > { %861 = vmatmul.mubr.msk.f32.gmra.mrb[8].mxu0 %vm265_vm0, %v249_v30  ;;  %978 = vmatpush3.bf16.msra.mxu1 %v956_v34 }
  0x2b   : > { %863 = vmatprep.mubr.msk.f32.mxu0 %vm265_vm0, %v250_v33  ;;  %951 = vmatpush3.bf16.msra.mxu0 %v948_v24 }
  0x2c   : > { %953 = vmatprep.subr.bf16.mxu0 %v952_v29  ;;  %971 = vmatprep.subr.bf16.mxu1 %v960_v42 }
  0x2e   : > { %864 = vmatmul.mubr.msk.f32.gmra.mrb[10].mxu0 %vm265_vm0, %v251_v35  ;;  %979 = vmatpush3.bf16.msra.mxu1 %v960_v42 }
  0x2f   : > { %866 = vmatprep.mubr.msk.f32.mxu0 %vm265_vm0, %v252_v36  ;;  %955 = vmatpush3.bf16.msra.mxu0 %v952_v29 }
  0x30   : > { %957 = vmatprep.subr.bf16.mxu0 %v956_v34 }
  0x32   : > { %867 = vmatmul.mubr.msk.f32.gmra.mrb[12].mxu0 %vm265_vm0, %v253_v37 }
  0x33   : > { %869 = vmatprep.mubr.msk.f32.mxu0 %vm265_vm0, %v254_v38  ;;  %959 = vmatpush3.bf16.msra.mxu0 %v956_v34 }
  0x34   : > { %961 = vmatprep.subr.bf16.mxu0 %v960_v42 }
  0x36   : > { %870 = vmatmul.mubr.msk.f32.gmra.mrb[14].mxu0 %vm265_vm0, %v255_v39 }
  0x37   : > { %963 = vmatpush3.bf16.msra.mxu0 %v960_v42 }
  0xed   : > { %v850_v44 = vpop.f32.mrb[0].mxu0 }
  0xee   : > { %v386_v45 = vadd.f32 %v850_v44, %v771_v43  ;;  %v380_v46 = vpop.f32.mrb[1].mxu0 }
  0xef   : > { %v381_v47 = vadd.f32 %v771_v43, %v380_v46 }
  0xf0   : > { %460 = vst [vmem:[%s1269_s7 + $0x8] sm:$0xff] %v386_v45 }
  0xf1   : > { %459 = vst [vmem:[%s1269_s7] sm:$0xff] %v381_v47  ;;  %v853_v48 = vpop.f32.mrb[2].mxu0  ;;  %904 = vmatprep.mubr.f32.mxu0 %v381_v47 }
  0xf2   : > { %v396_v49 = vadd.f32 %v853_v48, %v771_v43  ;;  %v390_v50 = vpop.f32.mrb[3].mxu0  ;;  %905 = vmatmul.mubr.f32.vlgmr.msra.gmra.mrb[16].mxu0 %v386_v45 }
  0xf3   : > { %v391_v51 = vadd.f32 %v771_v43, %v390_v50 }
  0xf4   : > { %462 = vst [vmem:[%s1269_s7 + $0x18] sm:$0xff] %v396_v49 }
  0xf5   : > { %461 = vst [vmem:[%s1269_s7 + $0x10] sm:$0xff] %v391_v51  ;;  %v856_v52 = vpop.f32.mrb[4].mxu0  ;;  %907 = vmatprep.mubr.f32.mxu0 %v391_v51 }
  0xf6   : > { %v406_v53 = vadd.f32 %v856_v52, %v771_v43  ;;  %v400_v54 = vpop.f32.mrb[5].mxu0  ;;  %908 = vmatmul.mubr.f32.gmra.mrb[18].mxu0 %v396_v49 }
  0xf7   : > { %v401_v55 = vadd.f32 %v771_v43, %v400_v54 }
  0xf8   : > { %464 = vst [vmem:[%s1269_s7 + $0x28] sm:$0xff] %v406_v53 }
  0xf9   : > { %463 = vst [vmem:[%s1269_s7 + $0x20] sm:$0xff] %v401_v55  ;;  %v859_v56 = vpop.f32.mrb[6].mxu0  ;;  %910 = vmatprep.mubr.f32.mxu0 %v401_v55 }
  0xfa   : > { %v416_v57 = vadd.f32 %v859_v56, %v771_v43  ;;  %v410_v58 = vpop.f32.mrb[7].mxu0  ;;  %911 = vmatmul.mubr.f32.gmra.mrb[20].mxu0 %v406_v53 }
  0xfb   : > { %v411_v59 = vadd.f32 %v771_v43, %v410_v58 }
  0xfc   : > { %466 = vst [vmem:[%s1269_s7 + $0x38] sm:$0xff] %v416_v57 }
  0xfd   : > { %465 = vst [vmem:[%s1269_s7 + $0x30] sm:$0xff] %v411_v59  ;;  %v862_v60 = vpop.f32.mrb[8].mxu0  ;;  %913 = vmatprep.mubr.f32.mxu1 %v411_v59 }
  0xfe   : > { %v426_v61 = vadd.f32 %v862_v60, %v771_v43  ;;  %v420_v62 = vpop.f32.mrb[9].mxu0  ;;  %914 = vmatmul.mubr.f32.vlgmr.msra.gmra.mrb[0].mxu1 %v416_v57 }
  0xff   : > { %v421_v63 = vadd.f32 %v771_v43, %v420_v62 }
 0x100   : > { %468 = vst [vmem:[%s1269_s7 + $0x48] sm:$0xff] %v426_v61 }
 0x101   : > { %467 = vst [vmem:[%s1269_s7 + $0x40] sm:$0xff] %v421_v63  ;;  %v865_v0 = vpop.f32.mrb[10].mxu0  ;;  %916 = vmatprep.mubr.f32.mxu1 %v421_v63 }
 0x102   : > { %v436_v1 = vadd.f32 %v865_v0, %v771_v43  ;;  %v430_v2 = vpop.f32.mrb[11].mxu0  ;;  %917 = vmatmul.mubr.f32.gmra.mrb[2].mxu1 %v426_v61 }
 0x103   : > { %v431_v3 = vadd.f32 %v771_v43, %v430_v2 }
 0x104   : > { %470 = vst [vmem:[%s1269_s7 + $0x58] sm:$0xff] %v436_v1 }
 0x105   : > { %469 = vst [vmem:[%s1269_s7 + $0x50] sm:$0xff] %v431_v3  ;;  %v868_v4 = vpop.f32.mrb[12].mxu0  ;;  %919 = vmatprep.mubr.f32.mxu1 %v431_v3 }
 0x106   : > { %v446_v5 = vadd.f32 %v868_v4, %v771_v43  ;;  %v440_v6 = vpop.f32.mrb[13].mxu0  ;;  %920 = vmatmul.mubr.f32.gmra.mrb[4].mxu1 %v436_v1 }
 0x107   : > { %v441_v7 = vadd.f32 %v771_v43, %v440_v6 }
 0x108   : > { %472 = vst [vmem:[%s1269_s7 + $0x68] sm:$0xff] %v446_v5 }
 0x109   : > { %471 = vst [vmem:[%s1269_s7 + $0x60] sm:$0xff] %v441_v7  ;;  %v871_v8 = vpop.f32.mrb[14].mxu0  ;;  %922 = vmatprep.mubr.f32.mxu1 %v441_v7 }
 0x10a   : > { %v456_v9 = vadd.f32 %v871_v8, %v771_v43  ;;  %v450_v10 = vpop.f32.mrb[15].mxu0  ;;  %923 = vmatmul.mubr.f32.gmra.mrb[6].mxu1 %v446_v5 }
 0x10b   : > { %v451_v11 = vadd.f32 %v771_v43, %v450_v10 }
 0x10c   : > { %474 = vst [vmem:[%s1269_s7 + $0x78] sm:$0xff] %v456_v9 }
 0x10d   : > { %473 = vst [vmem:[%s1269_s7 + $0x70] sm:$0xff] %v451_v11  ;;  %925 = vmatprep.mubr.f32.mxu1 %v451_v11 }
 0x10e   : > { %926 = vmatmul.mubr.f32.gmra.mrb[8].mxu1 %v456_v9 }
 0x10f   : > { %1034 = shalt.err (!%p1031_p3)
}
 0x110   : > { %s1035_s25 = scalar_lea.hbm %s1292_s13, 2048  ;;  %s1039_s6 = scalar_lea.hbm %s1382_s4, 4096 }
 0x111   : > { %p1036_p4 = scmp.ne.s32.totalorder %s1292_s13, %s1035_s25  ;;  %p1040_p9 = scmp.lt.u32.totalorder %s1292_s13, %s1382_s4 }
 0x112   : > { %p1041_p10 = scmp.lt.u32.totalorder %s1039_s6, %s1035_s25  ;;  %p1043_p12 = scmp.lt.u32.totalorder %s1035_s25, %s1292_s13 }
 0x113   : > { %p1037_p7 = pnand %p1036_p4, %p1156_p5 }
 0x114   : > { %p1042_p11 = por %p1041_p10, %p1040_p9 }
 0x115   : > { %p1038_p8 = pneg %p1037_p7 }
 0x116   : > { %p1044_p13 = por %p1043_p12, %p1042_p11 }
 0x118   : > { %p1045_p0 = pnand %p1044_p13, %p1038_p8 }
 0x11a   : > { %1048 = shalt.err (!%p1045_p0)
}
 0x11b   : > { %s1086_s11 = smov 128   ;;  %s1087_s12 = smov 8  }
 0x11c   : > { %980 = dma.vmem_to_hbm [thread:$0]  (%p1156_p5), %s1294_s10, 2048, %s1292_s13, %s1298_s14, %s1086_s11, %s1086_s11, %s1087_s12  }
 0x11d   : > { %s1327_s16 = scalar_lea.vmem %s1383_s5, %s768_s23 }
 0x1c5   : > { %v906_v12 = vpop.f32.mrb[16].mxu0 }
 0x1c6   : > { %637 = vst.msk [vmem:[%s1327_s16 + $0x8] sm:$0xff] %vm265_vm0, %v906_v12  ;;  %v557_v13 = vpop.f32.mrb[17].mxu0 }
 0x1c7   : > { %636 = vst.msk [vmem:[%s1327_s16] sm:$0xff] %vm265_vm0, %v557_v13 }
 0x1c9   : > { %v909_v14 = vpop.f32.mrb[18].mxu0 }
 0x1ca   : > { %639 = vst.msk [vmem:[%s1327_s16 + $0x18] sm:$0xff] %vm265_vm0, %v909_v14  ;;  %v567_v15 = vpop.f32.mrb[19].mxu0 }
 0x1cb   : > { %638 = vst.msk [vmem:[%s1327_s16 + $0x10] sm:$0xff] %vm265_vm0, %v567_v15 }
 0x1cd   : > { %v912_v16 = vpop.f32.mrb[20].mxu0 }
 0x1ce   : > { %641 = vst.msk [vmem:[%s1327_s16 + $0x28] sm:$0xff] %vm265_vm0, %v912_v16  ;;  %v577_v17 = vpop.f32.mrb[21].mxu0 }
 0x1cf   : > { %640 = vst.msk [vmem:[%s1327_s16 + $0x20] sm:$0xff] %vm265_vm0, %v577_v17 }
 0x1d1   : > { %v915_v18 = vpop.f32.mrb[0].mxu1 }
 0x1d2   : > { %643 = vst.msk [vmem:[%s1327_s16 + $0x38] sm:$0xff] %vm265_vm0, %v915_v18  ;;  %v587_v19 = vpop.f32.mrb[1].mxu1 }
 0x1d3   : > { %642 = vst.msk [vmem:[%s1327_s16 + $0x30] sm:$0xff] %vm265_vm0, %v587_v19 }
 0x1d5   : > { %v918_v20 = vpop.f32.mrb[2].mxu1 }
 0x1d6   : > { %645 = vst.msk [vmem:[%s1327_s16 + $0x48] sm:$0xff] %vm265_vm0, %v918_v20  ;;  %v597_v21 = vpop.f32.mrb[3].mxu1 }
 0x1d7   : > { %644 = vst.msk [vmem:[%s1327_s16 + $0x40] sm:$0xff] %vm265_vm0, %v597_v21 }
 0x1d9   : > { %v921_v22 = vpop.f32.mrb[4].mxu1 }
 0x1da   : > { %647 = vst.msk [vmem:[%s1327_s16 + $0x58] sm:$0xff] %vm265_vm0, %v921_v22  ;;  %v607_v23 = vpop.f32.mrb[5].mxu1 }
 0x1db   : > { %646 = vst.msk [vmem:[%s1327_s16 + $0x50] sm:$0xff] %vm265_vm0, %v607_v23 }
 0x1dd   : > { %v924_v24 = vpop.f32.mrb[6].mxu1 }
 0x1de   : > { %649 = vst.msk [vmem:[%s1327_s16 + $0x68] sm:$0xff] %vm265_vm0, %v924_v24  ;;  %v617_v25 = vpop.f32.mrb[7].mxu1 }
 0x1df   : > { %648 = vst.msk [vmem:[%s1327_s16 + $0x60] sm:$0xff] %vm265_vm0, %v617_v25 }
 0x1e1   : > { %v927_v26 = vpop.f32.mrb[8].mxu1 }
 0x1e2   : > { %651 = vst.msk [vmem:[%s1327_s16 + $0x78] sm:$0xff] %vm265_vm0, %v927_v26  ;;  %v627_v27 = vpop.f32.mrb[9].mxu1 }
 0x1e3   : > { %650 = vst.msk [vmem:[%s1327_s16 + $0x70] sm:$0xff] %vm265_vm0, %v627_v27 }
 0x1e4 PF: > { %p986_p5 = scmp.ge.s32.totalorder %s1083_s21, 2  ;;  %s690_s28 = sand.u32 1, %s1071_s18  }
 0x1e5   : > { %s691_s9 = scalar_lea.sflag [#allocation3], %s690_s28 }
 0x1e6   : > { %p983_p1 = pnand %p986_p5, %p1160_p6 }
 0x1e8   : > { %1066 = dma.done.wait (!%p983_p1), %s691_s9, 2048  }
 0x1e9   : > { %1068 = vsyncadd (!%p983_p1), %s691_s9, 4294965248  ;;  %p16_p2 = scmp.ge.s32.totalorder %s1143_s24, 4   ;;  %s1386_s18 = smov %s1075_s19 }
 0x1ea   : > { %s1387_s19 = smov %s1079_s20  ;;  %s1388_s20 = smov %s1154_s27 }
 0x1eb   : > { %s1389_s21 = smov %s1143_s24  ;;  %18 = sbr.rel (!%p16_p2) target bundleno = 3 (0x3), region = 83 }
 0x1f2   :  { %704 = vsyncpa [#allocation3], 1 }
 0x1f3   :  { %706 = vsyncpa [#allocation3 + $0x1], 1 }

</bundles_post_ra>
